<compile_context>
chip_gen: v5e
topology: v5e:2x2
jax: 0.10.0
libtpu: 0.0.40
codegen_flags: <defaults>
</compile_context>

<pallas_src>
import jax
import jax.numpy as jnp
from jax.experimental import pallas as pl
from jax.experimental.pallas import tpu as pltpu


def _round_up(n, m):
    return ((n + m - 1) // m) * m


def _mlp_kernel(*refs):
    """refs = (x_ref, w1, b1, w2, b2, ..., wn, bn, o_ref). Everything is a full
    VMEM block; intermediates stay in registers (shapes here are tiny)."""
    x_ref, o_ref = refs[0], refs[-1]
    param_refs = refs[1:-1]
    h = x_ref[...].astype(jnp.float32)
    for i in range(0, len(param_refs), 2):
        w = param_refs[i][...].astype(jnp.float32)
        b = param_refs[i + 1][...].astype(jnp.float32)
        # MXU matmul with f32 accumulate, bias add (VPU), tanh (EUP) — fused epilogue.
        h = jnp.tanh(jnp.dot(h, w, preferred_element_type=jnp.float32) + b)
    o_ref[...] = h.astype(o_ref.dtype)


@jax.jit
def mlp_forward(x, params):
    """Fused MLP forward: tanh(...tanh(tanh(x@w1+b1)@w2+b2)...) in one kernel.

    x: (B, in0); params: list of (w_i (in_i, out_i), b_i (1, out_i)).
    """
    B, d_in = x.shape
    n_layers = len(params)
    dims = [params[0][0].shape[0]] + [w.shape[1] for (w, _) in params]
    assert dims[0] == d_in

    # Lane/sublane-dense padded shapes.
    Bp = _round_up(max(B, 8), 8)
    pdims = [_round_up(d, 128) for d in dims]

    # Zero-pad input and parameters (zeros propagate as exact zeros through
    # matmul + zero-bias + tanh, so padded lanes never contaminate real lanes).
    x_p = jnp.zeros((Bp, pdims[0]), x.dtype).at[:B, :d_in].set(x)
    flat_params = []
    for i, (w, b) in enumerate(params):
        w_p = jnp.zeros((pdims[i], pdims[i + 1]), w.dtype).at[: w.shape[0], : w.shape[1]].set(w)
        b_p = jnp.zeros((1, pdims[i + 1]), b.dtype).at[:, : b.shape[1]].set(b)
        flat_params += [w_p, b_p]

    in_specs = [pl.BlockSpec((Bp, pdims[0]), lambda i: (0, 0))]
    for li in range(n_layers):
        in_specs.append(pl.BlockSpec((pdims[li], pdims[li + 1]), lambda i: (0, 0)))
        in_specs.append(pl.BlockSpec((1, pdims[li + 1]), lambda i: (0, 0)))

    itemsize = jnp.dtype(x.dtype).itemsize
    flops = sum(2 * Bp * pdims[li] * pdims[li + 1] for li in range(n_layers))
    transcendentals = sum(Bp * pdims[li + 1] for li in range(n_layers))
    bytes_accessed = itemsize * (
        x_p.size + sum(a.size for a in flat_params) + Bp * pdims[-1]
    )

    out_p = pl.pallas_call(
        _mlp_kernel,
        out_shape=jax.ShapeDtypeStruct((Bp, pdims[-1]), x.dtype),
        grid_spec=pltpu.PrefetchScalarGridSpec(
            num_scalar_prefetch=0,
            grid=(1,),
            in_specs=in_specs,
            out_specs=pl.BlockSpec((Bp, pdims[-1]), lambda i: (0, 0)),
        ),
        compiler_params=pltpu.CompilerParams(
            dimension_semantics=("arbitrary",),
        ),
        cost_estimate=pl.CostEstimate(
            flops=flops,
            transcendentals=transcendentals,
            bytes_accessed=bytes_accessed,
        ),
    )(x_p, *flat_params)

    # Slice away the padding.
    return out_p[:B, : dims[-1]]


def init_mlp_params(key, layer_sizes, dtype=jnp.float32):
    """Matches the PyTorch module's init: weight ~ Xavier(Glorot) normal,
    bias ~ U(-1/sqrt(in), 1/sqrt(in)) (nn.Linear default)."""
    params = []
    for (fan_in, fan_out) in layer_sizes:
        key, kw, kb = jax.random.split(key, 3)
        std = (2.0 / (fan_in + fan_out)) ** 0.5
        w = std * jax.random.normal(kw, (fan_in, fan_out), dtype=dtype)
        bound = 1.0 / (fan_in ** 0.5)
        b = jax.random.uniform(kb, (1, fan_out), minval=-bound, maxval=bound, dtype=dtype)
        params.append((w, b))
    return params


def mlp_reference(x, params):
    for (w, b) in params:
        x = jnp.tanh(x @ w + b)
    return x


if __name__ == "__main__":
    key = jax.random.PRNGKey(0)
    layer_sizes = [(32, 64), (64, 48), (48, 16)]

    key, kx = jax.random.split(key)
    batch = 8
    x = jax.random.normal(kx, (batch, layer_sizes[0][0]), dtype=jnp.float32)

    params = init_mlp_params(key, layer_sizes)

    out = mlp_forward(x, params)
    out = jax.block_until_ready(out)

    ref = mlp_reference(x, params)
    assert out.shape == (batch, layer_sizes[-1][1])
    assert jnp.allclose(out, ref, atol=1e-5, rtol=1e-5), "mismatch vs JAX reference"

    print("KERNEL_OK")
</pallas_src>

<mosaic_0001>
module attributes {stable_mosaic.version = 11 : i64} {
  func.func @_mlp_kernel(%arg0: i32, %arg1: memref<8x128xf32, #tpu.memory_space<vmem>>, %arg2: memref<128x128xf32, #tpu.memory_space<vmem>>, %arg3: memref<1x128xf32, #tpu.memory_space<vmem>>, %arg4: memref<128x128xf32, #tpu.memory_space<vmem>>, %arg5: memref<1x128xf32, #tpu.memory_space<vmem>>, %arg6: memref<128x128xf32, #tpu.memory_space<vmem>>, %arg7: memref<1x128xf32, #tpu.memory_space<vmem>>, %arg8: memref<8x128xf32, #tpu.memory_space<vmem>>) attributes {dimension_semantics = [#tpu.dimension_semantics<arbitrary>], iteration_bounds = array<i64: 1>, scalar_prefetch = 0 : i64, scratch_operands = 0 : i64, tpu.core_type = #tpu.core_type<tc>, window_params = [{pipeline_mode = #tpu.pipeline_mode<synchronous>, transform_indices = @transform_0, window_bounds = array<i64: 8, 128>}, {pipeline_mode = #tpu.pipeline_mode<synchronous>, transform_indices = @transform_1, window_bounds = array<i64: 128, 128>}, {pipeline_mode = #tpu.pipeline_mode<synchronous>, transform_indices = @transform_2, window_bounds = array<i64: 1, 128>}, {pipeline_mode = #tpu.pipeline_mode<synchronous>, transform_indices = @transform_3, window_bounds = array<i64: 128, 128>}, {pipeline_mode = #tpu.pipeline_mode<synchronous>, transform_indices = @transform_4, window_bounds = array<i64: 1, 128>}, {pipeline_mode = #tpu.pipeline_mode<synchronous>, transform_indices = @transform_5, window_bounds = array<i64: 128, 128>}, {pipeline_mode = #tpu.pipeline_mode<synchronous>, transform_indices = @transform_6, window_bounds = array<i64: 1, 128>}, {pipeline_mode = #tpu.pipeline_mode<synchronous>, transform_indices = @transform_7, window_bounds = array<i64: 8, 128>}]} {
    %c0 = arith.constant 0 : index
    %c0_0 = arith.constant 0 : index
    %0 = vector.load %arg1[%c0, %c0_0] : memref<8x128xf32, #tpu.memory_space<vmem>>, vector<8x128xf32>
    %c0_1 = arith.constant 0 : index
    %c0_2 = arith.constant 0 : index
    %1 = vector.load %arg2[%c0_1, %c0_2] : memref<128x128xf32, #tpu.memory_space<vmem>>, vector<128x128xf32>
    %c0_3 = arith.constant 0 : index
    %c0_4 = arith.constant 0 : index
    %2 = vector.load %arg3[%c0_3, %c0_4] : memref<1x128xf32, #tpu.memory_space<vmem>>, vector<1x128xf32>
    %cst = arith.constant dense<0.000000e+00> : vector<8x128xf32>
    %3 = tpu.matmul %0, %1, %cst {dimension_numbers = #tpu.dot_dimension_numbers<[1], [0], [0], [1], [0, 0, 1, 1], [], []>} : vector<8x128xf32>, vector<128x128xf32>, vector<8x128xf32> -> vector<8x128xf32>
    %4 = vector.broadcast %2 : vector<1x128xf32> to vector<8x128xf32>
    %5 = arith.addf %3, %4 : vector<8x128xf32>
    %6 = math.tanh %5 : vector<8x128xf32>
    %c0_5 = arith.constant 0 : index
    %c0_6 = arith.constant 0 : index
    %7 = vector.load %arg4[%c0_5, %c0_6] : memref<128x128xf32, #tpu.memory_space<vmem>>, vector<128x128xf32>
    %c0_7 = arith.constant 0 : index
    %c0_8 = arith.constant 0 : index
    %8 = vector.load %arg5[%c0_7, %c0_8] : memref<1x128xf32, #tpu.memory_space<vmem>>, vector<1x128xf32>
    %cst_9 = arith.constant dense<0.000000e+00> : vector<8x128xf32>
    %9 = tpu.matmul %6, %7, %cst_9 {dimension_numbers = #tpu.dot_dimension_numbers<[1], [0], [0], [1], [0, 0, 1, 1], [], []>} : vector<8x128xf32>, vector<128x128xf32>, vector<8x128xf32> -> vector<8x128xf32>
    %10 = vector.broadcast %8 : vector<1x128xf32> to vector<8x128xf32>
    %11 = arith.addf %9, %10 : vector<8x128xf32>
    %12 = math.tanh %11 : vector<8x128xf32>
    %c0_10 = arith.constant 0 : index
    %c0_11 = arith.constant 0 : index
    %13 = vector.load %arg6[%c0_10, %c0_11] : memref<128x128xf32, #tpu.memory_space<vmem>>, vector<128x128xf32>
    %c0_12 = arith.constant 0 : index
    %c0_13 = arith.constant 0 : index
    %14 = vector.load %arg7[%c0_12, %c0_13] : memref<1x128xf32, #tpu.memory_space<vmem>>, vector<1x128xf32>
    %cst_14 = arith.constant dense<0.000000e+00> : vector<8x128xf32>
    %15 = tpu.matmul %12, %13, %cst_14 {dimension_numbers = #tpu.dot_dimension_numbers<[1], [0], [0], [1], [0, 0, 1, 1], [], []>} : vector<8x128xf32>, vector<128x128xf32>, vector<8x128xf32> -> vector<8x128xf32>
    %16 = vector.broadcast %14 : vector<1x128xf32> to vector<8x128xf32>
    %17 = arith.addf %15, %16 : vector<8x128xf32>
    %18 = math.tanh %17 : vector<8x128xf32>
    %c0_15 = arith.constant 0 : index
    %c0_16 = arith.constant 0 : index
    %19 = vector.load %arg8[%c0_15, %c0_16] : memref<8x128xf32, #tpu.memory_space<vmem>>, vector<8x128xf32>
    tpu.vector_store %arg8[%c0_15, %c0_16], %18 {strides = array<i32>} : memref<8x128xf32, #tpu.memory_space<vmem>>, vector<8x128xf32>,
    return
  }
  func.func @transform_0(%arg0: i32) -> (i32, i32) {
    %c0_i32 = arith.constant 0 : i32
    %c0_i32_0 = arith.constant 0 : i32
    %c0_i32_1 = arith.constant 0 : i32
    return %c0_i32, %c0_i32_0 : i32, i32
  }
  func.func @transform_1(%arg0: i32) -> (i32, i32) {
    %c0_i32 = arith.constant 0 : i32
    %c0_i32_0 = arith.constant 0 : i32
    %c0_i32_1 = arith.constant 0 : i32
    return %c0_i32, %c0_i32_0 : i32, i32
  }
  func.func @transform_2(%arg0: i32) -> (i32, i32) {
    %c0_i32 = arith.constant 0 : i32
    %c0_i32_0 = arith.constant 0 : i32
    %c0_i32_1 = arith.constant 0 : i32
    return %c0_i32, %c0_i32_0 : i32, i32
  }
  func.func @transform_3(%arg0: i32) -> (i32, i32) {
    %c0_i32 = arith.constant 0 : i32
    %c0_i32_0 = arith.constant 0 : i32
    %c0_i32_1 = arith.constant 0 : i32
    return %c0_i32, %c0_i32_0 : i32, i32
  }
  func.func @transform_4(%arg0: i32) -> (i32, i32) {
    %c0_i32 = arith.constant 0 : i32
    %c0_i32_0 = arith.constant 0 : i32
    %c0_i32_1 = arith.constant 0 : i32
    return %c0_i32, %c0_i32_0 : i32, i32
  }
  func.func @transform_5(%arg0: i32) -> (i32, i32) {
    %c0_i32 = arith.constant 0 : i32
    %c0_i32_0 = arith.constant 0 : i32
    %c0_i32_1 = arith.constant 0 : i32
    return %c0_i32, %c0_i32_0 : i32, i32
  }
  func.func @transform_6(%arg0: i32) -> (i32, i32) {
    %c0_i32 = arith.constant 0 : i32
    %c0_i32_0 = arith.constant 0 : i32
    %c0_i32_1 = arith.constant 0 : i32
    return %c0_i32, %c0_i32_0 : i32, i32
  }
  func.func @transform_7(%arg0: i32) -> (i32, i32) {
    %c0_i32 = arith.constant 0 : i32
    %c0_i32_0 = arith.constant 0 : i32
    %c0_i32_1 = arith.constant 0 : i32
    return %c0_i32, %c0_i32_0 : i32, i32
  }
}

</mosaic_0001>

<bundles_post_ra>
// kernel: mlp_forward.1
= control target key start
LH: loop header
LB: loop body
LE: loop exit
PB: predicated region body
PF: predicated region fallthrough
CT: control target
= control target key end

     0   :  { %s404_s0 = inlined_call_operand.vmem [shape: f32[8,128], index: 0, kind: input, shape index: {}]   ;;  %s405_s1 = inlined_call_operand.vmem [shape: f32[128,128], index: 1, kind: input, shape index: {}]   ;;  %s406_s2 = inlined_call_operand.vmem [shape: f32[1,128], index: 2, kind: input, shape index: {}]   ;;  %s407_s3 = inlined_call_operand.vmem [shape: f32[128,128], index: 3, kind: input, shape index: {}]   ;;  %s408_s4 = inlined_call_operand.vmem [shape: f32[1,128], index: 4, kind: input, shape index: {}]   ;;  %s409_s5 = inlined_call_operand.vmem [shape: f32[128,128], index: 5, kind: input, shape index: {}]   ;;  %s410_s6 = inlined_call_operand.vmem [shape: f32[1,128], index: 6, kind: input, shape index: {}]   ;;  %s411_s7 = inlined_call_operand.hbm [shape: f32[8,128], index: 7, kind: output, shape index: {}]  }
   0x1   :  { %v43_v0 = vld [vmem:[%s405_s1 + $0x78] sm:$0xff]  ;;  %v42_v1 = vld [vmem:[%s405_s1 + $0x70] sm:$0xff]  ;;  %v41_v2 = vld [vmem:[%s405_s1 + $0x68] sm:$0xff] }
   0x2   :  { %48 = vmatpush.msra.mxu0 %v43_v0  ;;  %v40_v3 = vld [vmem:[%s405_s1 + $0x60] sm:$0xff]  ;;  %v84_v4 = vld [vmem:[%s407_s3 + $0x78] sm:$0xff]  ;;  %v83_v6 = vld [vmem:[%s407_s3 + $0x70] sm:$0xff] }
   0x3   :  { %v39_v5 = vld [vmem:[%s405_s1 + $0x58] sm:$0xff]  ;;  %89 = vmatpush.msra.mxu1 %v84_v4  ;;  %v82_v7 = vld [vmem:[%s407_s3 + $0x68] sm:$0xff]  ;;  %v38_v8 = vld [vmem:[%s405_s1 + $0x50] sm:$0xff] }
   0x4   :  { %49 = vmatpush.msra.mxu0 %v42_v1  ;;  %v37_v9 = vld [vmem:[%s405_s1 + $0x48] sm:$0xff]  ;;  %v81_v10 = vld [vmem:[%s407_s3 + $0x60] sm:$0xff] }
   0x5   :  { %90 = vmatpush.msra.mxu1 %v83_v6 }
   0x6   :  { %50 = vmatpush.msra.mxu0 %v41_v2 }
   0x7   :  { %91 = vmatpush.msra.mxu1 %v82_v7 }
   0x8   :  { %51 = vmatpush.msra.mxu0 %v40_v3 }
   0xa   :  { %52 = vmatpush.msra.mxu0 %v39_v5 }
   0xb   :  { %12 = vsyncpa [#allocation3], 0  ;;  %v80_v11 = vld [vmem:[%s407_s3 + $0x58] sm:$0xff]  ;;  %v36_v12 = vld [vmem:[%s405_s1 + $0x40] sm:$0xff]  ;;  %92 = vmatpush.msra.mxu1 %v81_v10  ;;  %s204_s29 = smov [#allocation2]   ;;  %s159_s9 = sshll.u32 %s411_s7, 4  ;;  %s160_s9 = int_to_ptr.hbm [resolvable:$true] %s159_s9 }
   0xc   :  { %53 = vmatpush.msra.mxu0 %v38_v8  ;;  %v79_v13 = vld [vmem:[%s407_s3 + $0x50] sm:$0xff]  ;;  %v35_v14 = vld [vmem:[%s405_s1 + $0x38] sm:$0xff]  ;;  %v78_v15 = vld [vmem:[%s407_s3 + $0x48] sm:$0xff] }
   0xd   :  { %93 = vmatpush.msra.mxu1 %v80_v11  ;;  %v34_v16 = vld [vmem:[%s405_s1 + $0x30] sm:$0xff]  ;;  %v77_v17 = vld [vmem:[%s407_s3 + $0x40] sm:$0xff]  ;;  %v33_v18 = vld [vmem:[%s405_s1 + $0x28] sm:$0xff] }
   0xe   :  { %54 = vmatpush.msra.mxu0 %v37_v9  ;;  %v76_v19 = vld [vmem:[%s407_s3 + $0x38] sm:$0xff]  ;;  %v32_v20 = vld [vmem:[%s405_s1 + $0x20] sm:$0xff]  ;;  %v75_v21 = vld [vmem:[%s407_s3 + $0x30] sm:$0xff] }
   0xf   :  { %94 = vmatpush.msra.mxu1 %v79_v13  ;;  %v31_v22 = vld [vmem:[%s405_s1 + $0x18] sm:$0xff]  ;;  %v74_v23 = vld [vmem:[%s407_s3 + $0x28] sm:$0xff]  ;;  %v30_v24 = vld [vmem:[%s405_s1 + $0x10] sm:$0xff] }
  0x10   :  { %55 = vmatpush.msra.mxu0 %v36_v12  ;;  %v29_v25 = vld [vmem:[%s405_s1 + $0x8] sm:$0xff]  ;;  %v28_v26 = vld [vmem:[%s405_s1] sm:$0xff]  ;;  %v72_v29 = vld [vmem:[%s407_s3 + $0x18] sm:$0xff] }
  0x11   :  { %95 = vmatpush.msra.mxu1 %v78_v15  ;;  %v27_v27 = vld [vmem:[%s404_s0] sm:$0xff]  ;;  %v71_v30 = vld [vmem:[%s407_s3 + $0x10] sm:$0xff]  ;;  %v70_v31 = vld [vmem:[%s407_s3 + $0x8] sm:$0xff] }
  0x12   :  { %56 = vmatpush.msra.mxu0 %v35_v14  ;;  %v73_v28 = vld [vmem:[%s407_s3 + $0x20] sm:$0xff]  ;;  %v125_v33 = vld [vmem:[%s409_s5 + $0x78] sm:$0xff]  ;;  %v124_v34 = vld [vmem:[%s409_s5 + $0x70] sm:$0xff] }
  0x13   :  { %96 = vmatpush.msra.mxu1 %v77_v17  ;;  %v69_v32 = vld [vmem:[%s407_s3] sm:$0xff]  ;;  %130 = vmatpush.msra.mxu2 %v125_v33  ;;  %v123_v35 = vld [vmem:[%s409_s5 + $0x68] sm:$0xff]  ;;  %v121_v37 = vld [vmem:[%s409_s5 + $0x58] sm:$0xff] }
  0x14   :  { %57 = vmatpush.msra.mxu0 %v34_v16  ;;  %v122_v36 = vld [vmem:[%s409_s5 + $0x60] sm:$0xff]  ;;  %v120_v38 = vld [vmem:[%s409_s5 + $0x50] sm:$0xff]  ;;  %v119_v39 = vld [vmem:[%s409_s5 + $0x48] sm:$0xff] }
  0x15   :  { %97 = vmatpush.msra.mxu1 %v76_v19  ;;  %131 = vmatpush.msra.mxu2 %v124_v34  ;;  %v118_v40 = vld [vmem:[%s409_s5 + $0x40] sm:$0xff]  ;;  %v117_v41 = vld [vmem:[%s409_s5 + $0x38] sm:$0xff]  ;;  %v116_v42 = vld [vmem:[%s409_s5 + $0x30] sm:$0xff] }
  0x16   :  { %58 = vmatpush.msra.mxu0 %v33_v18  ;;  %v115_v43 = vld [vmem:[%s409_s5 + $0x28] sm:$0xff]  ;;  %v169_v44 = vld [vmem:[%s406_s2] ss:$0 sm:$0xff]  ;;  %v113_v49 = vld [vmem:[%s409_s5 + $0x18] sm:$0xff] }
  0x17   :  { %98 = vmatpush.msra.mxu1 %v75_v21  ;;  %132 = vmatpush.msra.mxu2 %v123_v35  ;;  %v114_v48 = vld [vmem:[%s409_s5 + $0x20] sm:$0xff]  ;;  %v112_v50 = vld [vmem:[%s409_s5 + $0x10] sm:$0xff]  ;;  %v111_v51 = vld [vmem:[%s409_s5 + $0x8] sm:$0xff] }
  0x18   :  { %59 = vmatpush.msra.mxu0 %v32_v20  ;;  %v110_v52 = vld [vmem:[%s409_s5] sm:$0xff]  ;;  %s157_s5 = sshll.u32 %s204_s29, 4  ;;  %s158_s5 = int_to_ptr.vmem [resolvable:$true] %s157_s5 }
  0x19   :  { %99 = vmatpush.msra.mxu1 %v74_v23  ;;  %133 = vmatpush.msra.mxu2 %v122_v36  ;;  %v170_v53 = vld [vmem:[%s408_s4] ss:$0 sm:$0xff] }
  0x1a   :  { %60 = vmatpush.msra.mxu0 %v31_v22  ;;  %v171_v57 = vld [vmem:[%s410_s6] ss:$0 sm:$0xff] }
  0x1b   :  { %100 = vmatpush.msra.mxu1 %v73_v28  ;;  %134 = vmatpush.msra.mxu2 %v121_v37 }
  0x1c   :  { %61 = vmatpush.msra.mxu0 %v30_v24 }
  0x1d   :  { %101 = vmatpush.msra.mxu1 %v72_v29  ;;  %135 = vmatpush.msra.mxu2 %v120_v38 }
  0x1e   :  { %62 = vmatpush.msra.mxu0 %v29_v25 }
  0x1f   :  { %102 = vmatpush.msra.mxu1 %v71_v30  ;;  %136 = vmatpush.msra.mxu2 %v119_v39 }
  0x20   :  { %63 = vmatpush.msra.mxu0 %v28_v26 }
  0x21   :  { %64 = vmatmul.f32.vlgmr.msra.gmra.mxu0 %v27_v27  ;;  %103 = vmatpush.msra.mxu1 %v70_v31 }
  0x22   :  { %137 = vmatpush.msra.mxu2 %v118_v40 }
  0x23   :  { %104 = vmatpush.msra.mxu1 %v69_v32 }
  0x24   :  { %138 = vmatpush.msra.mxu2 %v117_v41 }
  0x26   :  { %139 = vmatpush.msra.mxu2 %v116_v42 }
  0x28   :  { %140 = vmatpush.msra.mxu2 %v115_v43 }
  0x2a   :  { %141 = vmatpush.msra.mxu2 %v114_v48 }
  0x2c   :  { %142 = vmatpush.msra.mxu2 %v113_v49 }
  0x2e   :  { %143 = vmatpush.msra.mxu2 %v112_v50 }
  0x30   :  { %144 = vmatpush.msra.mxu2 %v111_v51 }
  0x32   :  { %145 = vmatpush.msra.mxu2 %v110_v52 }
  0x9e   :  { %v65_v45 = vpop.f32.mrf.mxu0 }
  0x9f   :  { %v66_v46 = vadd.f32 %v169_v44, %v65_v45 }
  0xa1   :  { %172 = vtanh.f32 %v66_v46 }
  0xa7   :  { %v173_v47 = vpop.eup %172 }
  0xa8   :  { %105 = vmatmul.f32.vlgmr.msra.gmra.mxu1 %v173_v47 }
 0x125   :  { %v106_v54 = vpop.f32.mrf.mxu1 }
 0x126   :  { %v107_v55 = vadd.f32 %v170_v53, %v106_v54 }
 0x128   :  { %174 = vtanh.f32 %v107_v55 }
 0x12e   :  { %v175_v56 = vpop.eup %174 }
 0x12f   :  { %146 = vmatmul.f32.vlgmr.msra.gmra.mxu2 %v175_v56 }
 0x1b2   :  { %v147_v58 = vpop.f32.mrf.mxu2 }
 0x1b3   :  { %v148_v59 = vadd.f32 %v171_v57, %v147_v58 }
 0x1b5   :  { %176 = vtanh.f32 %v148_v59 }
 0x1bb   :  { %v177_v60 = vpop.eup %176 }
 0x1bc   :  { %151 = vst [vmem:[#allocation2] sm:$0xff] %v177_v60 }
 0x1bd   :  { %162 = dma.vmem_to_hbm [thread:$0]  %s158_s5, 128, %s160_s9, [#allocation3]  }
 0x1be   :  { %202 = dma.done.wait [#allocation3], 128  }
 0x1bf   :  { %203 = vsyncadd [#allocation3], 4294967168 }
 0x1c0   :  { %167 = vsyncpa [#allocation3], 1 }

</bundles_post_ra>
